<compile_context>
chip_gen: v6e
topology: v6e:2x2x1
jax: 0.10.0
libtpu: 0.0.40
codegen_flags: <defaults>
</compile_context>

<pallas_src>
import functools

import jax
import jax.numpy as jnp
from jax import lax
from jax.experimental import pallas as pl
from jax.experimental.pallas import tpu as pltpu


def _seq_value_kernel(x_ref, w_ref, b_ref, eh_ref, value_ref, *, t, bp):
    """Grid-less, fully VMEM-resident bidirectional-GRU value head.

    x_ref  : (t*bp, d)           time-major, batch padded to bp rows
    w_ref  : (nlayers*3, 2H, 6H) per layer [WA, WB, Wh_blockdiag]
    b_ref  : (nlayers*2, 6H)     per layer [bx_combined ; bhn (padded to 6H)]
    eh_ref : (d+4, 2H)           [w_emb ; b_emb ; wv_fwd ; wv_bwd ; b_val row]
    value  : (bp, 1)
    """
    d = x_ref.shape[1]
    nlayers = w_ref.shape[0] // 3
    h2 = w_ref.shape[1]          # 2H  (= hdim)
    H = h2 // 2
    h4 = 4 * H

    w_emb = eh_ref[0:d, :]                       # (d, 2H)
    b_emb = eh_ref[d:d + 1, :]                   # (1, 2H)

    # Hoisted embedding for the whole padded sequence (off the recurrence).
    S = (jnp.dot(x_ref[...], w_emb, preferred_element_type=jnp.float32)
         + b_emb)                                # (t*bp, 2H)

    hs = None
    for layer in range(nlayers):                 # static unroll over layers
        wa = w_ref[3 * layer]                    # (2H, 6H)
        wb = w_ref[3 * layer + 1]                # (2H, 6H)
        wh = w_ref[3 * layer + 2]                # (2H, 6H) block-diagonal
        bx = b_ref[2 * layer:2 * layer + 1, :]              # (1, 6H)
        bhn = b_ref[2 * layer + 1:2 * layer + 2, 0:h2]      # (1, 2H)

        # Hoisted x-side projections.  Row block i of (GA[i] + GB[t-1-i]) is
        # the per-iteration pre-activation: fwd-gate columns from time i,
        # bwd-gate columns from time t-1-i (and, for layer > 0, the previous
        # layer's fwd/bwd concat is folded into WA/WB algebraically).
        ga = jnp.dot(S, wa, preferred_element_type=jnp.float32) + bx   # (t*bp, 6H)
        gb = jnp.dot(S, wb, preferred_element_type=jnp.float32)        # (t*bp, 6H)

        h = jnp.zeros((bp, h2), jnp.float32)     # [h_f | h_b]
        hs = []
        for step in range(t):                    # static unroll, both dirs fused
            ridx = t - 1 - step
            gx = (ga[step * bp:(step + 1) * bp]
                  + gb[ridx * bp:(ridx + 1) * bp])                    # (bp, 6H)
            gh = jnp.dot(h, wh, preferred_element_type=jnp.float32)   # (bp, 6H)
            # one sigmoid over the contiguous [r_f r_b z_f z_b] lanes
            rz = jax.nn.sigmoid(gx[:, :h4] + gh[:, :h4])              # (bp, 4H)
            # one tanh over the contiguous [n_f n_b] lanes
            n = jnp.tanh(gx[:, h4:] + rz[:, :h2] * (gh[:, h4:] + bhn))
            h = n + rz[:, h2:h4] * (h - n)       # (1-z)*n + z*h
            hs.append(h)

        if layer < nlayers - 1:
            # Next-layer input slab in iteration order: block i = [f(i)|b(t-1-i)].
            S = jnp.concatenate(hs, axis=0)      # (t*bp, 2H)

    # rnn_out[:, -1] = [f(t-1) | b(t-1)].  f(t-1) sits in hs[t-1][:, :H],
    # b(t-1) in hs[0][:, H:]; the value head is folded into two masked weight
    # rows so no lane concat / N=1 MXU dot is needed.
    wvf = eh_ref[d + 1:d + 2, :]                 # (1, 2H)  [w_val[:H] | 0]
    wvb = eh_ref[d + 2:d + 3, :]                 # (1, 2H)  [0 | w_val[H:]]
    bval = eh_ref[d + 3:d + 4, 0:1]              # (1, 1)
    vvec = hs[t - 1] * wvf + hs[0] * wvb         # (bp, 2H)
    value_ref[...] = jnp.sum(vvec, axis=-1, keepdims=True) + bval


def value_forward(state, params):
    """state: (b, t, d) float32 -> value (b, 1)."""
    b, t, d = state.shape
    hdim = params["w_emb"].shape[1]
    H = hdim // 2
    nlayers = params["wxr"].shape[0] // 2
    bp = ((b + 7) // 8) * 8                      # sublane-aligned batch

    # ---- input: time-major, batch-padded, pre-flattened (no in-kernel reshape)
    x_tm = jnp.transpose(state, (1, 0, 2)).astype(jnp.float32)      # (t, b, d)
    x_tm = jnp.pad(x_tm, ((0, 0), (0, bp - b), (0, 0)))
    x_slab = x_tm.reshape(t * bp, d)                                 # (t*bp, d)

    # Gate-column layout (6H): [r_f | r_b | z_f | z_b | n_f | n_b].
    ZH = jnp.zeros((H, H), jnp.float32)
    Z2H = jnp.zeros((hdim, H), jnp.float32)

    def col6(rf, rb, zf, zb, nf, nb):
        return jnp.concatenate([rf, rb, zf, zb, nf, nb], axis=1)

    w_rows, b_rows = [], []
    for l in range(nlayers):
        f, bd = 2 * l, 2 * l + 1
        wxr_f, wxz_f, wxn_f = params["wxr"][f], params["wxz"][f], params["wxn"][f]
        wxr_b, wxz_b, wxn_b = params["wxr"][bd], params["wxz"][bd], params["wxn"][bd]
        if l == 0:
            # layer-0 input is the embedded sequence (no fwd/bwd split).
            wa = col6(wxr_f, Z2H, wxz_f, Z2H, wxn_f, Z2H)
            wb = col6(Z2H, wxr_b, Z2H, wxz_b, Z2H, wxn_b)
        else:
            # Fold the previous layer's [fwd|bwd] concat + time reversal of the
            # bwd half into the projection: GA multiplies the slab block at
            # iteration i, GB the block at iteration t-1-i.
            wa = jnp.concatenate(
                [col6(wxr_f[:H], ZH, wxz_f[:H], ZH, wxn_f[:H], ZH),
                 col6(ZH, wxr_b[H:], ZH, wxz_b[H:], ZH, wxn_b[H:])], axis=0)
            wb = jnp.concatenate(
                [col6(ZH, wxr_b[:H], ZH, wxz_b[:H], ZH, wxn_b[:H]),
                 col6(wxr_f[H:], ZH, wxz_f[H:], ZH, wxn_f[H:], ZH)], axis=0)
        # Block-diagonal hidden weight: h = [h_f | h_b] -> all 6 gate columns.
        wh = jnp.concatenate(
            [col6(params["whr"][f], ZH, params["whz"][f], ZH, params["whn"][f], ZH),
             col6(ZH, params["whr"][bd], ZH, params["whz"][bd], ZH, params["whn"][bd])],
            axis=0)
        w_rows += [wa, wb, wh]

        bx = jnp.concatenate(
            [params["bxr"][f] + params["bhr"][f], params["bxr"][bd] + params["bhr"][bd],
             params["bxz"][f] + params["bhz"][f], params["bxz"][bd] + params["bhz"][bd],
             params["bxn"][f], params["bxn"][bd]], axis=1)            # (1, 6H)
        bhn = jnp.concatenate(
            [params["bhn"][f], params["bhn"][bd],
             jnp.zeros((1, 4 * H), jnp.float32)], axis=1)             # (1, 6H)
        b_rows += [bx, bhn]

    w_stack = jnp.stack(w_rows).astype(jnp.float32)      # (3*nlayers, 2H, 6H)
    b_stack = jnp.concatenate(b_rows, axis=0).astype(jnp.float32)     # (2*nlayers, 6H)

    wvf = jnp.concatenate([params["w_val"][:H, 0],
                           jnp.zeros((H,), jnp.float32)])[None]       # (1, 2H)
    wvb = jnp.concatenate([jnp.zeros((H,), jnp.float32),
                           params["w_val"][H:, 0]])[None]             # (1, 2H)
    bval_row = jnp.zeros((1, hdim), jnp.float32).at[0, 0].set(params["b_val"][0, 0])
    emb_head = jnp.concatenate(
        [params["w_emb"], params["b_emb"], wvf, wvb, bval_row],
        axis=0).astype(jnp.float32)                                   # (d+4, 2H)

    vmem = pl.BlockSpec(memory_space=pltpu.MemorySpace.VMEM)
    kernel = functools.partial(_seq_value_kernel, t=t, bp=bp)
    value_p = pl.pallas_call(
        kernel,
        out_shape=jax.ShapeDtypeStruct((bp, 1), jnp.float32),
        in_specs=[vmem, vmem, vmem, vmem],
        out_specs=vmem,
    )(x_slab, w_stack, b_stack, emb_head)
    return value_p[:b]


def init_params(key, indim, hdim, nlayers):
    """Deterministic synthetic weights (PyTorch-style uniform fan-in init)."""
    H = hdim // 2
    nl2 = 2 * nlayers
    ks = jax.random.split(key, 18)

    def u(k, shape, fan):
        bound = 1.0 / float(fan) ** 0.5
        return jax.random.uniform(k, shape, jnp.float32, -bound, bound)

    return {
        "w_emb": u(ks[0], (indim, hdim), indim),
        "b_emb": u(ks[1], (1, hdim), indim),
        "wxr": u(ks[2], (nl2, hdim, H), H), "wxz": u(ks[3], (nl2, hdim, H), H),
        "wxn": u(ks[4], (nl2, hdim, H), H),
        "whr": u(ks[5], (nl2, H, H), H), "whz": u(ks[6], (nl2, H, H), H),
        "whn": u(ks[7], (nl2, H, H), H),
        "bxr": u(ks[8], (nl2, 1, H), H), "bxz": u(ks[9], (nl2, 1, H), H),
        "bxn": u(ks[10], (nl2, 1, H), H),
        "bhr": u(ks[11], (nl2, 1, H), H), "bhz": u(ks[12], (nl2, 1, H), H),
        "bhn": u(ks[13], (nl2, 1, H), H),
        "w_val": u(ks[14], (hdim, 1), hdim),
        "b_val": u(ks[15], (1, 1), hdim),
    }


def reference_forward(state, p):
    """Pure-JAX reference of SequenceValueFn.forward() (PyTorch GRU semantics)."""
    b, t, d = state.shape
    hdim = p["w_emb"].shape[1]
    H = p["whr"].shape[-1]
    nlayers = p["wxr"].shape[0] // 2
    hi = lax.Precision.HIGHEST

    x = (jnp.dot(state.reshape(b * t, d), p["w_emb"], precision=hi)
         + p["b_emb"][0]).reshape(b, t, hdim)

    def cell(x_t, h, ld):
        r = jax.nn.sigmoid(jnp.dot(x_t, p["wxr"][ld], precision=hi) + p["bxr"][ld][0]
                           + jnp.dot(h, p["whr"][ld], precision=hi) + p["bhr"][ld][0])
        z = jax.nn.sigmoid(jnp.dot(x_t, p["wxz"][ld], precision=hi) + p["bxz"][ld][0]
                           + jnp.dot(h, p["whz"][ld], precision=hi) + p["bhz"][ld][0])
        n = jnp.tanh(jnp.dot(x_t, p["wxn"][ld], precision=hi) + p["bxn"][ld][0]
                     + r * (jnp.dot(h, p["whn"][ld], precision=hi) + p["bhn"][ld][0]))
        return (1.0 - z) * n + z * h

    for layer in range(nlayers):
        ldf, ldb = 2 * layer, 2 * layer + 1
        hf = jnp.zeros((b, H), jnp.float32)
        outs_f = []
        for ti in range(t):
            hf = cell(x[:, ti], hf, ldf)
            outs_f.append(hf)
        hb = jnp.zeros((b, H), jnp.float32)
        outs_b = [None] * t
        for ti in range(t - 1, -1, -1):
            hb = cell(x[:, ti], hb, ldb)
            outs_b[ti] = hb
        x = jnp.concatenate([jnp.stack(outs_f, 1), jnp.stack(outs_b, 1)], axis=-1)

    last = x[:, -1, :]                                        # (b, hdim)
    return jnp.dot(last, p["w_val"], precision=hi) + p["b_val"][0]


if __name__ == "__main__":
    key = jax.random.PRNGKey(0)
    for (b, t, indim, hdim, nlayers) in [(2, 8, 16, 32, 1), (2, 8, 16, 32, 2)]:
        k_state, k_params, key = jax.random.split(key, 3)
        state = jax.random.normal(k_state, (b, t, indim), dtype=jnp.float32)
        params = init_params(k_params, indim, hdim, nlayers)

        value = value_forward(state, params)
        jax.block_until_ready(value)

        ref = reference_forward(state, params)
        assert value.shape == (b, 1)
        err = float(jnp.max(jnp.abs(value - ref)))
        # default-precision f32 MXU matmuls vs HIGHEST-precision reference
        # over an 8-step recurrence -> small safety margin on the tolerance
        assert jnp.allclose(value, ref, atol=2e-3, rtol=2e-3), (nlayers, err)

    print("KERNEL_OK")
</pallas_src>

<mosaic_0001>
module attributes {stable_mosaic.version = 11 : i64} {
  func.func @_seq_value_kernel(%arg0: memref<64x16xf32, #tpu.memory_space<vmem>>, %arg1: memref<3x32x96xf32, #tpu.memory_space<vmem>>, %arg2: memref<2x96xf32, #tpu.memory_space<vmem>>, %arg3: memref<20x32xf32, #tpu.memory_space<vmem>>, %arg4: memref<8x1xf32, #tpu.memory_space<vmem>>) attributes {dimension_semantics = [], scalar_prefetch = 0 : i64, scratch_operands = 0 : i64, tpu.core_type = #tpu.core_type<tc>} {
    %c0 = arith.constant 0 : index
    %c0_0 = arith.constant 0 : index
    %0 = vector.load %arg3[%c0, %c0_0] : memref<20x32xf32, #tpu.memory_space<vmem>>, vector<16x32xf32>
    %c16 = arith.constant 16 : index
    %c0_1 = arith.constant 0 : index
    %1 = vector.load %arg3[%c16, %c0_1] : memref<20x32xf32, #tpu.memory_space<vmem>>, vector<1x32xf32>
    %c0_2 = arith.constant 0 : index
    %c0_3 = arith.constant 0 : index
    %2 = vector.load %arg0[%c0_2, %c0_3] : memref<64x16xf32, #tpu.memory_space<vmem>>, vector<64x16xf32>
    %cst = arith.constant dense<0.000000e+00> : vector<64x32xf32>
    %3 = tpu.matmul %2, %0, %cst {dimension_numbers = #tpu.dot_dimension_numbers<[1], [0], [0], [1], [0, 0, 1, 1], [], []>} : vector<64x16xf32>, vector<16x32xf32>, vector<64x32xf32> -> vector<64x32xf32>
    %4 = vector.broadcast %1 : vector<1x32xf32> to vector<64x32xf32>
    %5 = arith.addf %3, %4 : vector<64x32xf32>
    %c0_4 = arith.constant 0 : index
    %c0_5 = arith.constant 0 : index
    %c0_6 = arith.constant 0 : index
    %6 = vector.load %arg1[%c0_4, %c0_5, %c0_6] : memref<3x32x96xf32, #tpu.memory_space<vmem>>, vector<1x32x96xf32>
    %7 = vector.shape_cast %6 : vector<1x32x96xf32> to vector<32x96xf32>
    %c1 = arith.constant 1 : index
    %c0_7 = arith.constant 0 : index
    %c0_8 = arith.constant 0 : index
    %8 = vector.load %arg1[%c1, %c0_7, %c0_8] : memref<3x32x96xf32, #tpu.memory_space<vmem>>, vector<1x32x96xf32>
    %9 = vector.shape_cast %8 : vector<1x32x96xf32> to vector<32x96xf32>
    %c2 = arith.constant 2 : index
    %c0_9 = arith.constant 0 : index
    %c0_10 = arith.constant 0 : index
    %10 = vector.load %arg1[%c2, %c0_9, %c0_10] : memref<3x32x96xf32, #tpu.memory_space<vmem>>, vector<1x32x96xf32>
    %11 = vector.shape_cast %10 : vector<1x32x96xf32> to vector<32x96xf32>
    %c0_11 = arith.constant 0 : index
    %c0_12 = arith.constant 0 : index
    %12 = vector.load %arg2[%c0_11, %c0_12] : memref<2x96xf32, #tpu.memory_space<vmem>>, vector<1x96xf32>
    %c1_13 = arith.constant 1 : index
    %c0_14 = arith.constant 0 : index
    %13 = vector.load %arg2[%c1_13, %c0_14] : memref<2x96xf32, #tpu.memory_space<vmem>>, vector<1x32xf32>
    %cst_15 = arith.constant dense<0.000000e+00> : vector<64x96xf32>
    %14 = tpu.matmul %5, %7, %cst_15 {dimension_numbers = #tpu.dot_dimension_numbers<[1], [0], [0], [1], [0, 0, 1, 1], [], []>} : vector<64x32xf32>, vector<32x96xf32>, vector<64x96xf32> -> vector<64x96xf32>
    %15 = vector.broadcast %12 : vector<1x96xf32> to vector<64x96xf32>
    %16 = arith.addf %14, %15 : vector<64x96xf32>
    %cst_16 = arith.constant dense<0.000000e+00> : vector<64x96xf32>
    %17 = tpu.matmul %5, %9, %cst_16 {dimension_numbers = #tpu.dot_dimension_numbers<[1], [0], [0], [1], [0, 0, 1, 1], [], []>} : vector<64x32xf32>, vector<32x96xf32>, vector<64x96xf32> -> vector<64x96xf32>
    %cst_17 = arith.constant 0.000000e+00 : f32
    %18 = vector.broadcast %cst_17 : f32 to vector<8x32xf32>
    %19 = vector.extract_strided_slice %16 {offsets = [0, 0], sizes = [8, 96], strides = [1, 1]} : vector<64x96xf32> to vector<8x96xf32>
    %20 = vector.extract_strided_slice %17 {offsets = [56, 0], sizes = [8, 96], strides = [1, 1]} : vector<64x96xf32> to vector<8x96xf32>
    %21 = arith.addf %19, %20 : vector<8x96xf32>
    %cst_18 = arith.constant dense<0.000000e+00> : vector<8x96xf32>
    %22 = tpu.matmul %18, %11, %cst_18 {dimension_numbers = #tpu.dot_dimension_numbers<[1], [0], [0], [1], [0, 0, 1, 1], [], []>} : vector<8x32xf32>, vector<32x96xf32>, vector<8x96xf32> -> vector<8x96xf32>
    %23 = vector.extract_strided_slice %21 {offsets = [0, 0], sizes = [8, 64], strides = [1, 1]} : vector<8x96xf32> to vector<8x64xf32>
    %24 = vector.extract_strided_slice %22 {offsets = [0, 0], sizes = [8, 64], strides = [1, 1]} : vector<8x96xf32> to vector<8x64xf32>
    %25 = arith.addf %23, %24 : vector<8x64xf32>
    %26 = arith.negf %25 : vector<8x64xf32>
    %27 = math.exp %26 : vector<8x64xf32>
    %cst_19 = arith.constant 1.000000e+00 : f32
    %28 = vector.broadcast %cst_19 : f32 to vector<8x64xf32>
    %29 = arith.addf %28, %27 : vector<8x64xf32>
    %30 = arith.divf %28, %29 : vector<8x64xf32>
    %31 = vector.extract_strided_slice %21 {offsets = [0, 64], sizes = [8, 32], strides = [1, 1]} : vector<8x96xf32> to vector<8x32xf32>
    %32 = vector.extract_strided_slice %30 {offsets = [0, 0], sizes = [8, 32], strides = [1, 1]} : vector<8x64xf32> to vector<8x32xf32>
    %33 = vector.extract_strided_slice %22 {offsets = [0, 64], sizes = [8, 32], strides = [1, 1]} : vector<8x96xf32> to vector<8x32xf32>
    %34 = vector.broadcast %13 : vector<1x32xf32> to vector<8x32xf32>
    %35 = arith.addf %33, %34 : vector<8x32xf32>
    %36 = arith.mulf %32, %35 : vector<8x32xf32>
    %37 = arith.addf %31, %36 : vector<8x32xf32>
    %38 = math.tanh %37 : vector<8x32xf32>
    %39 = vector.extract_strided_slice %30 {offsets = [0, 32], sizes = [8, 32], strides = [1, 1]} : vector<8x64xf32> to vector<8x32xf32>
    %40 = arith.subf %18, %38 : vector<8x32xf32>
    %41 = arith.mulf %39, %40 : vector<8x32xf32>
    %42 = arith.addf %38, %41 : vector<8x32xf32>
    %43 = vector.extract_strided_slice %16 {offsets = [8, 0], sizes = [8, 96], strides = [1, 1]} : vector<64x96xf32> to vector<8x96xf32>
    %44 = vector.extract_strided_slice %17 {offsets = [48, 0], sizes = [8, 96], strides = [1, 1]} : vector<64x96xf32> to vector<8x96xf32>
    %45 = arith.addf %43, %44 : vector<8x96xf32>
    %cst_20 = arith.constant dense<0.000000e+00> : vector<8x96xf32>
    %46 = tpu.matmul %42, %11, %cst_20 {dimension_numbers = #tpu.dot_dimension_numbers<[1], [0], [0], [1], [0, 0, 1, 1], [], []>} : vector<8x32xf32>, vector<32x96xf32>, vector<8x96xf32> -> vector<8x96xf32>
    %47 = vector.extract_strided_slice %45 {offsets = [0, 0], sizes = [8, 64], strides = [1, 1]} : vector<8x96xf32> to vector<8x64xf32>
    %48 = vector.extract_strided_slice %46 {offsets = [0, 0], sizes = [8, 64], strides = [1, 1]} : vector<8x96xf32> to vector<8x64xf32>
    %49 = arith.addf %47, %48 : vector<8x64xf32>
    %50 = arith.negf %49 : vector<8x64xf32>
    %51 = math.exp %50 : vector<8x64xf32>
    %cst_21 = arith.constant 1.000000e+00 : f32
    %52 = vector.broadcast %cst_21 : f32 to vector<8x64xf32>
    %53 = arith.addf %52, %51 : vector<8x64xf32>
    %54 = arith.divf %52, %53 : vector<8x64xf32>
    %55 = vector.extract_strided_slice %45 {offsets = [0, 64], sizes = [8, 32], strides = [1, 1]} : vector<8x96xf32> to vector<8x32xf32>
    %56 = vector.extract_strided_slice %54 {offsets = [0, 0], sizes = [8, 32], strides = [1, 1]} : vector<8x64xf32> to vector<8x32xf32>
    %57 = vector.extract_strided_slice %46 {offsets = [0, 64], sizes = [8, 32], strides = [1, 1]} : vector<8x96xf32> to vector<8x32xf32>
    %58 = vector.broadcast %13 : vector<1x32xf32> to vector<8x32xf32>
    %59 = arith.addf %57, %58 : vector<8x32xf32>
    %60 = arith.mulf %56, %59 : vector<8x32xf32>
    %61 = arith.addf %55, %60 : vector<8x32xf32>
    %62 = math.tanh %61 : vector<8x32xf32>
    %63 = vector.extract_strided_slice %54 {offsets = [0, 32], sizes = [8, 32], strides = [1, 1]} : vector<8x64xf32> to vector<8x32xf32>
    %64 = arith.subf %42, %62 : vector<8x32xf32>
    %65 = arith.mulf %63, %64 : vector<8x32xf32>
    %66 = arith.addf %62, %65 : vector<8x32xf32>
    %67 = vector.extract_strided_slice %16 {offsets = [16, 0], sizes = [8, 96], strides = [1, 1]} : vector<64x96xf32> to vector<8x96xf32>
    %68 = vector.extract_strided_slice %17 {offsets = [40, 0], sizes = [8, 96], strides = [1, 1]} : vector<64x96xf32> to vector<8x96xf32>
    %69 = arith.addf %67, %68 : vector<8x96xf32>
    %cst_22 = arith.constant dense<0.000000e+00> : vector<8x96xf32>
    %70 = tpu.matmul %66, %11, %cst_22 {dimension_numbers = #tpu.dot_dimension_numbers<[1], [0], [0], [1], [0, 0, 1, 1], [], []>} : vector<8x32xf32>, vector<32x96xf32>, vector<8x96xf32> -> vector<8x96xf32>
    %71 = vector.extract_strided_slice %69 {offsets = [0, 0], sizes = [8, 64], strides = [1, 1]} : vector<8x96xf32> to vector<8x64xf32>
    %72 = vector.extract_strided_slice %70 {offsets = [0, 0], sizes = [8, 64], strides = [1, 1]} : vector<8x96xf32> to vector<8x64xf32>
    %73 = arith.addf %71, %72 : vector<8x64xf32>
    %74 = arith.negf %73 : vector<8x64xf32>
    %75 = math.exp %74 : vector<8x64xf32>
    %cst_23 = arith.constant 1.000000e+00 : f32
    %76 = vector.broadcast %cst_23 : f32 to vector<8x64xf32>
    %77 = arith.addf %76, %75 : vector<8x64xf32>
    %78 = arith.divf %76, %77 : vector<8x64xf32>
    %79 = vector.extract_strided_slice %69 {offsets = [0, 64], sizes = [8, 32], strides = [1, 1]} : vector<8x96xf32> to vector<8x32xf32>
    %80 = vector.extract_strided_slice %78 {offsets = [0, 0], sizes = [8, 32], strides = [1, 1]} : vector<8x64xf32> to vector<8x32xf32>
    %81 = vector.extract_strided_slice %70 {offsets = [0, 64], sizes = [8, 32], strides = [1, 1]} : vector<8x96xf32> to vector<8x32xf32>
    %82 = vector.broadcast %13 : vector<1x32xf32> to vector<8x32xf32>
    %83 = arith.addf %81, %82 : vector<8x32xf32>
    %84 = arith.mulf %80, %83 : vector<8x32xf32>
    %85 = arith.addf %79, %84 : vector<8x32xf32>
    %86 = math.tanh %85 : vector<8x32xf32>
    %87 = vector.extract_strided_slice %78 {offsets = [0, 32], sizes = [8, 32], strides = [1, 1]} : vector<8x64xf32> to vector<8x32xf32>
    %88 = arith.subf %66, %86 : vector<8x32xf32>
    %89 = arith.mulf %87, %88 : vector<8x32xf32>
    %90 = arith.addf %86, %89 : vector<8x32xf32>
    %91 = vector.extract_strided_slice %16 {offsets = [24, 0], sizes = [8, 96], strides = [1, 1]} : vector<64x96xf32> to vector<8x96xf32>
    %92 = vector.extract_strided_slice %17 {offsets = [32, 0], sizes = [8, 96], strides = [1, 1]} : vector<64x96xf32> to vector<8x96xf32>
    %93 = arith.addf %91, %92 : vector<8x96xf32>
    %cst_24 = arith.constant dense<0.000000e+00> : vector<8x96xf32>
    %94 = tpu.matmul %90, %11, %cst_24 {dimension_numbers = #tpu.dot_dimension_numbers<[1], [0], [0], [1], [0, 0, 1, 1], [], []>} : vector<8x32xf32>, vector<32x96xf32>, vector<8x96xf32> -> vector<8x96xf32>
    %95 = vector.extract_strided_slice %93 {offsets = [0, 0], sizes = [8, 64], strides = [1, 1]} : vector<8x96xf32> to vector<8x64xf32>
    %96 = vector.extract_strided_slice %94 {offsets = [0, 0], sizes = [8, 64], strides = [1, 1]} : vector<8x96xf32> to vector<8x64xf32>
    %97 = arith.addf %95, %96 : vector<8x64xf32>
    %98 = arith.negf %97 : vector<8x64xf32>
    %99 = math.exp %98 : vector<8x64xf32>
    %cst_25 = arith.constant 1.000000e+00 : f32
    %100 = vector.broadcast %cst_25 : f32 to vector<8x64xf32>
    %101 = arith.addf %100, %99 : vector<8x64xf32>
    %102 = arith.divf %100, %101 : vector<8x64xf32>
    %103 = vector.extract_strided_slice %93 {offsets = [0, 64], sizes = [8, 32], strides = [1, 1]} : vector<8x96xf32> to vector<8x32xf32>
    %104 = vector.extract_strided_slice %102 {offsets = [0, 0], sizes = [8, 32], strides = [1, 1]} : vector<8x64xf32> to vector<8x32xf32>
    %105 = vector.extract_strided_slice %94 {offsets = [0, 64], sizes = [8, 32], strides = [1, 1]} : vector<8x96xf32> to vector<8x32xf32>
    %106 = vector.broadcast %13 : vector<1x32xf32> to vector<8x32xf32>
    %107 = arith.addf %105, %106 : vector<8x32xf32>
    %108 = arith.mulf %104, %107 : vector<8x32xf32>
    %109 = arith.addf %103, %108 : vector<8x32xf32>
    %110 = math.tanh %109 : vector<8x32xf32>
    %111 = vector.extract_strided_slice %102 {offsets = [0, 32], sizes = [8, 32], strides = [1, 1]} : vector<8x64xf32> to vector<8x32xf32>
    %112 = arith.subf %90, %110 : vector<8x32xf32>
    %113 = arith.mulf %111, %112 : vector<8x32xf32>
    %114 = arith.addf %110, %113 : vector<8x32xf32>
    %115 = vector.extract_strided_slice %16 {offsets = [32, 0], sizes = [8, 96], strides = [1, 1]} : vector<64x96xf32> to vector<8x96xf32>
    %116 = vector.extract_strided_slice %17 {offsets = [24, 0], sizes = [8, 96], strides = [1, 1]} : vector<64x96xf32> to vector<8x96xf32>
    %117 = arith.addf %115, %116 : vector<8x96xf32>
    %cst_26 = arith.constant dense<0.000000e+00> : vector<8x96xf32>
    %118 = tpu.matmul %114, %11, %cst_26 {dimension_numbers = #tpu.dot_dimension_numbers<[1], [0], [0], [1], [0, 0, 1, 1], [], []>} : vector<8x32xf32>, vector<32x96xf32>, vector<8x96xf32> -> vector<8x96xf32>
    %119 = vector.extract_strided_slice %117 {offsets = [0, 0], sizes = [8, 64], strides = [1, 1]} : vector<8x96xf32> to vector<8x64xf32>
    %120 = vector.extract_strided_slice %118 {offsets = [0, 0], sizes = [8, 64], strides = [1, 1]} : vector<8x96xf32> to vector<8x64xf32>
    %121 = arith.addf %119, %120 : vector<8x64xf32>
    %122 = arith.negf %121 : vector<8x64xf32>
    %123 = math.exp %122 : vector<8x64xf32>
    %cst_27 = arith.constant 1.000000e+00 : f32
    %124 = vector.broadcast %cst_27 : f32 to vector<8x64xf32>
    %125 = arith.addf %124, %123 : vector<8x64xf32>
    %126 = arith.divf %124, %125 : vector<8x64xf32>
    %127 = vector.extract_strided_slice %117 {offsets = [0, 64], sizes = [8, 32], strides = [1, 1]} : vector<8x96xf32> to vector<8x32xf32>
    %128 = vector.extract_strided_slice %126 {offsets = [0, 0], sizes = [8, 32], strides = [1, 1]} : vector<8x64xf32> to vector<8x32xf32>
    %129 = vector.extract_strided_slice %118 {offsets = [0, 64], sizes = [8, 32], strides = [1, 1]} : vector<8x96xf32> to vector<8x32xf32>
    %130 = vector.broadcast %13 : vector<1x32xf32> to vector<8x32xf32>
    %131 = arith.addf %129, %130 : vector<8x32xf32>
    %132 = arith.mulf %128, %131 : vector<8x32xf32>
    %133 = arith.addf %127, %132 : vector<8x32xf32>
    %134 = math.tanh %133 : vector<8x32xf32>
    %135 = vector.extract_strided_slice %126 {offsets = [0, 32], sizes = [8, 32], strides = [1, 1]} : vector<8x64xf32> to vector<8x32xf32>
    %136 = arith.subf %114, %134 : vector<8x32xf32>
    %137 = arith.mulf %135, %136 : vector<8x32xf32>
    %138 = arith.addf %134, %137 : vector<8x32xf32>
    %139 = vector.extract_strided_slice %16 {offsets = [40, 0], sizes = [8, 96], strides = [1, 1]} : vector<64x96xf32> to vector<8x96xf32>
    %140 = vector.extract_strided_slice %17 {offsets = [16, 0], sizes = [8, 96], strides = [1, 1]} : vector<64x96xf32> to vector<8x96xf32>
    %141 = arith.addf %139, %140 : vector<8x96xf32>
    %cst_28 = arith.constant dense<0.000000e+00> : vector<8x96xf32>
    %142 = tpu.matmul %138, %11, %cst_28 {dimension_numbers = #tpu.dot_dimension_numbers<[1], [0], [0], [1], [0, 0, 1, 1], [], []>} : vector<8x32xf32>, vector<32x96xf32>, vector<8x96xf32> -> vector<8x96xf32>
    %143 = vector.extract_strided_slice %141 {offsets = [0, 0], sizes = [8, 64], strides = [1, 1]} : vector<8x96xf32> to vector<8x64xf32>
    %144 = vector.extract_strided_slice %142 {offsets = [0, 0], sizes = [8, 64], strides = [1, 1]} : vector<8x96xf32> to vector<8x64xf32>
    %145 = arith.addf %143, %144 : vector<8x64xf32>
    %146 = arith.negf %145 : vector<8x64xf32>
    %147 = math.exp %146 : vector<8x64xf32>
    %cst_29 = arith.constant 1.000000e+00 : f32
    %148 = vector.broadcast %cst_29 : f32 to vector<8x64xf32>
    %149 = arith.addf %148, %147 : vector<8x64xf32>
    %150 = arith.divf %148, %149 : vector<8x64xf32>
    %151 = vector.extract_strided_slice %141 {offsets = [0, 64], sizes = [8, 32], strides = [1, 1]} : vector<8x96xf32> to vector<8x32xf32>
    %152 = vector.extract_strided_slice %150 {offsets = [0, 0], sizes = [8, 32], strides = [1, 1]} : vector<8x64xf32> to vector<8x32xf32>
    %153 = vector.extract_strided_slice %142 {offsets = [0, 64], sizes = [8, 32], strides = [1, 1]} : vector<8x96xf32> to vector<8x32xf32>
    %154 = vector.broadcast %13 : vector<1x32xf32> to vector<8x32xf32>
    %155 = arith.addf %153, %154 : vector<8x32xf32>
    %156 = arith.mulf %152, %155 : vector<8x32xf32>
    %157 = arith.addf %151, %156 : vector<8x32xf32>
    %158 = math.tanh %157 : vector<8x32xf32>
    %159 = vector.extract_strided_slice %150 {offsets = [0, 32], sizes = [8, 32], strides = [1, 1]} : vector<8x64xf32> to vector<8x32xf32>
    %160 = arith.subf %138, %158 : vector<8x32xf32>
    %161 = arith.mulf %159, %160 : vector<8x32xf32>
    %162 = arith.addf %158, %161 : vector<8x32xf32>
    %163 = vector.extract_strided_slice %16 {offsets = [48, 0], sizes = [8, 96], strides = [1, 1]} : vector<64x96xf32> to vector<8x96xf32>
    %164 = vector.extract_strided_slice %17 {offsets = [8, 0], sizes = [8, 96], strides = [1, 1]} : vector<64x96xf32> to vector<8x96xf32>
    %165 = arith.addf %163, %164 : vector<8x96xf32>
    %cst_30 = arith.constant dense<0.000000e+00> : vector<8x96xf32>
    %166 = tpu.matmul %162, %11, %cst_30 {dimension_numbers = #tpu.dot_dimension_numbers<[1], [0], [0], [1], [0, 0, 1, 1], [], []>} : vector<8x32xf32>, vector<32x96xf32>, vector<8x96xf32> -> vector<8x96xf32>
    %167 = vector.extract_strided_slice %165 {offsets = [0, 0], sizes = [8, 64], strides = [1, 1]} : vector<8x96xf32> to vector<8x64xf32>
    %168 = vector.extract_strided_slice %166 {offsets = [0, 0], sizes = [8, 64], strides = [1, 1]} : vector<8x96xf32> to vector<8x64xf32>
    %169 = arith.addf %167, %168 : vector<8x64xf32>
    %170 = arith.negf %169 : vector<8x64xf32>
    %171 = math.exp %170 : vector<8x64xf32>
    %cst_31 = arith.constant 1.000000e+00 : f32
    %172 = vector.broadcast %cst_31 : f32 to vector<8x64xf32>
    %173 = arith.addf %172, %171 : vector<8x64xf32>
    %174 = arith.divf %172, %173 : vector<8x64xf32>
    %175 = vector.extract_strided_slice %165 {offsets = [0, 64], sizes = [8, 32], strides = [1, 1]} : vector<8x96xf32> to vector<8x32xf32>
    %176 = vector.extract_strided_slice %174 {offsets = [0, 0], sizes = [8, 32], strides = [1, 1]} : vector<8x64xf32> to vector<8x32xf32>
    %177 = vector.extract_strided_slice %166 {offsets = [0, 64], sizes = [8, 32], strides = [1, 1]} : vector<8x96xf32> to vector<8x32xf32>
    %178 = vector.broadcast %13 : vector<1x32xf32> to vector<8x32xf32>
    %179 = arith.addf %177, %178 : vector<8x32xf32>
    %180 = arith.mulf %176, %179 : vector<8x32xf32>
    %181 = arith.addf %175, %180 : vector<8x32xf32>
    %182 = math.tanh %181 : vector<8x32xf32>
    %183 = vector.extract_strided_slice %174 {offsets = [0, 32], sizes = [8, 32], strides = [1, 1]} : vector<8x64xf32> to vector<8x32xf32>
    %184 = arith.subf %162, %182 : vector<8x32xf32>
    %185 = arith.mulf %183, %184 : vector<8x32xf32>
    %186 = arith.addf %182, %185 : vector<8x32xf32>
    %187 = vector.extract_strided_slice %16 {offsets = [56, 0], sizes = [8, 96], strides = [1, 1]} : vector<64x96xf32> to vector<8x96xf32>
    %188 = vector.extract_strided_slice %17 {offsets = [0, 0], sizes = [8, 96], strides = [1, 1]} : vector<64x96xf32> to vector<8x96xf32>
    %189 = arith.addf %187, %188 : vector<8x96xf32>
    %cst_32 = arith.constant dense<0.000000e+00> : vector<8x96xf32>
    %190 = tpu.matmul %186, %11, %cst_32 {dimension_numbers = #tpu.dot_dimension_numbers<[1], [0], [0], [1], [0, 0, 1, 1], [], []>} : vector<8x32xf32>, vector<32x96xf32>, vector<8x96xf32> -> vector<8x96xf32>
    %191 = vector.extract_strided_slice %189 {offsets = [0, 0], sizes = [8, 64], strides = [1, 1]} : vector<8x96xf32> to vector<8x64xf32>
    %192 = vector.extract_strided_slice %190 {offsets = [0, 0], sizes = [8, 64], strides = [1, 1]} : vector<8x96xf32> to vector<8x64xf32>
    %193 = arith.addf %191, %192 : vector<8x64xf32>
    %194 = arith.negf %193 : vector<8x64xf32>
    %195 = math.exp %194 : vector<8x64xf32>
    %cst_33 = arith.constant 1.000000e+00 : f32
    %196 = vector.broadcast %cst_33 : f32 to vector<8x64xf32>
    %197 = arith.addf %196, %195 : vector<8x64xf32>
    %198 = arith.divf %196, %197 : vector<8x64xf32>
    %199 = vector.extract_strided_slice %189 {offsets = [0, 64], sizes = [8, 32], strides = [1, 1]} : vector<8x96xf32> to vector<8x32xf32>
    %200 = vector.extract_strided_slice %198 {offsets = [0, 0], sizes = [8, 32], strides = [1, 1]} : vector<8x64xf32> to vector<8x32xf32>
    %201 = vector.extract_strided_slice %190 {offsets = [0, 64], sizes = [8, 32], strides = [1, 1]} : vector<8x96xf32> to vector<8x32xf32>
    %202 = vector.broadcast %13 : vector<1x32xf32> to vector<8x32xf32>
    %203 = arith.addf %201, %202 : vector<8x32xf32>
    %204 = arith.mulf %200, %203 : vector<8x32xf32>
    %205 = arith.addf %199, %204 : vector<8x32xf32>
    %206 = math.tanh %205 : vector<8x32xf32>
    %207 = vector.extract_strided_slice %198 {offsets = [0, 32], sizes = [8, 32], strides = [1, 1]} : vector<8x64xf32> to vector<8x32xf32>
    %208 = arith.subf %186, %206 : vector<8x32xf32>
    %209 = arith.mulf %207, %208 : vector<8x32xf32>
    %210 = arith.addf %206, %209 : vector<8x32xf32>
    %c17 = arith.constant 17 : index
    %c0_34 = arith.constant 0 : index
    %211 = vector.load %arg3[%c17, %c0_34] : memref<20x32xf32, #tpu.memory_space<vmem>>, vector<1x32xf32>
    %c18 = arith.constant 18 : index
    %c0_35 = arith.constant 0 : index
    %212 = vector.load %arg3[%c18, %c0_35] : memref<20x32xf32, #tpu.memory_space<vmem>>, vector<1x32xf32>
    %c19 = arith.constant 19 : index
    %c0_36 = arith.constant 0 : index
    %213 = vector.load %arg3[%c19, %c0_36] : memref<20x32xf32, #tpu.memory_space<vmem>>, vector<1x1xf32>
    %214 = vector.broadcast %211 : vector<1x32xf32> to vector<8x32xf32>
    %215 = arith.mulf %210, %214 : vector<8x32xf32>
    %216 = vector.broadcast %212 : vector<1x32xf32> to vector<8x32xf32>
    %217 = arith.mulf %42, %216 : vector<8x32xf32>
    %218 = arith.addf %215, %217 : vector<8x32xf32>
    %cst_37 = arith.constant dense<0.000000e+00> : vector<8xf32>
    %219 = vector.multi_reduction <add>, %218, %cst_37 [1] : vector<8x32xf32> to vector<8xf32>
    %220 = vector.shape_cast %219 : vector<8xf32> to vector<8x1xf32>
    %221 = vector.broadcast %213 : vector<1x1xf32> to vector<8x1xf32>
    %222 = arith.addf %220, %221 : vector<8x1xf32>
    %c0_38 = arith.constant 0 : index
    %c0_39 = arith.constant 0 : index
    %223 = vector.load %arg4[%c0_38, %c0_39] : memref<8x1xf32, #tpu.memory_space<vmem>>, vector<8x1xf32>
    tpu.vector_store %arg4[%c0_38, %c0_39], %222 {strides = array<i32>} : memref<8x1xf32, #tpu.memory_space<vmem>>, vector<8x1xf32>,
    return
  }
}

</mosaic_0001>

<bundles_post_ra>
// kernel: tpu_custom_call.1
= control target key start
LH: loop header
LB: loop body
LE: loop exit
PB: predicated region body
PF: predicated region fallthrough
CT: control target
= control target key end

     0   :  { %9 = vsyncpa [#allocation3], 0  ;;  %s1667_s15 = smov [#allocation2]   ;;  %s1960_s0 = inlined_call_operand.vmem [shape: f32[64,16], index: 0, kind: input, shape index: {}]   ;;  %s1961_s1 = inlined_call_operand.hbm [shape: f32[3,32,96], index: 1, kind: input, shape index: {}]   ;;  %s1962_s2 = inlined_call_operand.vmem [shape: f32[2,96], index: 2, kind: input, shape index: {}]   ;;  %s1963_s3 = inlined_call_operand.vmem [shape: f32[20,32], index: 3, kind: input, shape index: {}]   ;;  %s1964_s4 = inlined_call_operand.vmem [shape: f32[8,1], index: 4, kind: output, shape index: {}]  }
   0x1   :  { %s17_s16 = sshll.u32 %s1667_s15, 4  ;;  %s18_s16 = int_to_ptr.vmem [resolvable:$true] %s17_s16 }
   0x2   :  { %s1653_s17 = scalar_lea.vmem %s18_s16, 1536  ;;  %p1658_p1 = scmp.lt.s32.totalorder %s18_s16, %s18_s16 }
   0x3   :  { %p1654_p0 = scmp.ne.s32.totalorder %s18_s16, %s1653_s17  ;;  %p1659_p2 = scmp.lt.s32.totalorder %s1653_s17, %s1653_s17 }
   0x5   :  { %p1660_p3 = por %p1659_p2, %p1658_p1 }
   0x7   :  { %p1661_p4 = pnand %p1660_p3, %p1654_p0 }
   0x9   :  { %1664 = shalt.err (!%p1661_p4)
}
   0xa   :  { %s1668_s18 = smov 128   ;;  %s1669_s19 = smov 8  }
   0xb   :  { %23 = dma.hbm_to_vmem [thread:$0]  %s1961_s1, 1536, %s18_s16, [#allocation3], %s1668_s18, %s1668_s18, %s1669_s19  }
   0xc   :  { %1665 = dma.done.wait [#allocation3], 1536  }
   0xd   :  { %1666 = vsyncadd [#allocation3], 4294965760  ;;  %vm46_vm0 = vcmask 130048   ;;  %v32_v0 = vld [vmem:[%s1963_s3 + $0x8] sm:$0xff]  ;;  %v31_v1 = vld [vmem:[%s1963_s3] sm:$0xff]  ;;  %v1670_v18 = vmov 0.0  }
   0xe   :  { %v34_v2 = vld [vmem:[%s1960_s0] sm:$0xff]  ;;  %1445 = vmatprep.subr.mxu0 %v32_v0  ;;  %v35_v3 = vld [vmem:[%s1960_s0 + $0x8] sm:$0xff]  ;;  %v36_v4 = vld [vmem:[%s1960_s0 + $0x10] sm:$0xff]  ;;  %s1671_s16 = smov 64   ;;  %vm196_vm1 = vcmask 261120   ;;  %vm1672_vm2 = vmmov 0  }
   0xf   :  { %1449 = vmatprep.mubr.msk.f32.mxu0 %vm46_vm0, %v34_v2  ;;  %1446 = vmatpush3.msra.mxu0 %v32_v0  ;;  %v179_v5 = vld [vmem:[#allocation2 + $0x18] sm:$0xff]  ;;  %v178_v7 = vld [vmem:[#allocation2 + $0x10] sm:$0xff]  ;;  %v38_v9 = vld [vmem:[%s1960_s0 + $0x20] sm:$0xff]  ;;  %s1674_s21 = smov 32   ;;  %vm1319_vm3 = vcmask 7168  }
  0x10   :  { %1447 = vmatprep.subr.mxu0 %v31_v1  ;;  %v184_v6 = vld [vmem:[#allocation2 + $0x38] sm:$0xff]  ;;  %1461 = vmatprep.subr.mxu1 %v179_v5  ;;  %v39_v10 = vld [vmem:[%s1960_s0 + $0x28] sm:$0xff]  ;;  %v40_v11 = vld [vmem:[%s1960_s0 + $0x30] sm:$0xff] }
  0x11   :  { %1448 = vmatpush3.msra.mxu0 %v31_v1  ;;  %1462 = vmatpush3.msra.mxu1 %v179_v5  ;;  %v37_v8 = vld [vmem:[%s1960_s0 + $0x18] sm:$0xff]  ;;  %v183_v13 = vld [vmem:[#allocation2 + $0x30] sm:$0xff]  ;;  %v177_v14 = vld [vmem:[#allocation2 + $0x8] sm:$0xff] }
  0x12   :  { %1450 = vmatmul.mubr.msk.f32.vlgmr.msra.gmra.mxu0 %vm46_vm0, %v35_v3  ;;  %1481 = vmatprep.subr.mxu0 %v184_v6  ;;  %v41_v12 = vld [vmem:[%s1960_s0 + $0x38] sm:$0xff]  ;;  %v182_v15 = vld [vmem:[#allocation2 + $0x28] sm:$0xff]  ;;  %v176_v16 = vld [vmem:[#allocation2] sm:$0xff] }
  0x13   :  { %1452 = vmatprep.mubr.msk.f32.mxu0 %vm46_vm0, %v36_v4  ;;  %1463 = vmatprep.subr.mxu1 %v178_v7  ;;  %v181_v17 = vld [vmem:[#allocation2 + $0x20] sm:$0xff]  ;;  %v1326_v21 = vld [vmem:[%s1963_s3 + $0x10] ss:$0 sm:$0xff]  ;;  %v1750_v26 = vld [vmem:[#allocation2 + $0x58] sm:$0xff] }
  0x14   :  { %1482 = vmatpush3.msra.mxu0 %v184_v6  ;;  %1464 = vmatpush3.msra.mxu1 %v178_v7  ;;  %v1353_v19 = vld [vmem:[%s1962_s2 + $0x1] ss:$0 sm:$0xff]  ;;  %v1759_v31 = vld [vmem:[#allocation2 + $0x50] sm:$0xff]  ;;  %v1769_v36 = vld [vmem:[#allocation2 + $0x48] sm:$0xff] }
  0x15   :  { %1483 = vmatprep.subr.mxu0 %v183_v13  ;;  %1465 = vmatprep.subr.mxu1 %v177_v14  ;;  %v1779_v40 = vld [vmem:[#allocation2 + $0x40] sm:$0xff] }
  0x16   :  { %1453 = vmatmul.mubr.msk.f32.gmra.mxu0 %vm46_vm0, %v37_v8  ;;  %1466 = vmatpush3.msra.mxu1 %v177_v14  ;;  %v1335_v41 = vld [vmem:[%s1962_s2] ss:$0 sm:$0xff]  ;;  %s1673_s2 = smov 96  }
  0x17   :  { %1455 = vmatprep.mubr.msk.f32.mxu0 %vm46_vm0, %v38_v9  ;;  %1484 = vmatpush3.msra.mxu0 %v183_v13 }
  0x18   :  { %1485 = vmatprep.subr.mxu0 %v182_v15  ;;  %1467 = vmatprep.subr.mxu1 %v176_v16 }
  0x19   :  { %1486 = vmatpush3.msra.mxu0 %v182_v15  ;;  %1468 = vmatpush3.msra.mxu1 %v176_v16 }
  0x1a   :  { %1456 = vmatmul.mubr.msk.f32.gmra.mxu0 %vm46_vm0, %v39_v10  ;;  %1487 = vmatprep.subr.mxu0 %v181_v17 }
  0x1b   :  { %1458 = vmatprep.mubr.msk.f32.mxu0 %vm46_vm0, %v40_v11  ;;  %1488 = vmatpush3.msra.mxu0 %v181_v17 }
  0x1c   :  { %1501 = vmatprep.subr.mxu1 %v1670_v18  ;;  %1523 = vmatprep.subr.mxu0 %v1670_v18 }
  0x1d   :  { %517 = vrot.lane.b32.xlu0 %v1353_v19, %s1671_s16 }
  0x1e   :  { %1459 = vmatmul.mubr.msk.f32.gmra.mxu0 %vm46_vm0, %v41_v12 }
  0x8f   :  { %v1818_v2 = vpop.permute.xlu0 %517 }
  0xd2   :  { %v1451_v20 = vpop.f32.mrf.mxu0 }
  0xd3   :  { %v143_v24 = vadd.f32 %v1451_v20, %v1326_v21 }
  0xd4   :  { %v137_v22 = vpop.f32.mrf.mxu0 }
  0xd5   :  { %v138_v23 = vadd.f32 %v1326_v21, %v137_v22 }
  0xd6   :  { %v1454_v25 = vpop.f32.mrf.mxu0 }
  0xd7   :  { %1469 = vmatprep.mubr.msk.f32.mxu1 %vm196_vm1, %v138_v23  ;;  %1489 = vmatprep.mubr.msk.f32.mxu0 %vm196_vm1, %v138_v23  ;;  %v153_v29 = vadd.f32 %v1454_v25, %v1326_v21 }
  0xd8   :  { %v147_v27 = vpop.f32.mrf.mxu0  ;;  %1470 = vmatmul.mubr.msk.f32.vlgmr.msra.gmra.mxu1 %vm196_vm1, %v143_v24  ;;  %1490 = vmatmul.mubr.msk.f32.vlgmr.msra.gmra.mxu0 %vm196_vm1, %v143_v24 }
  0xd9   :  { %v148_v28 = vadd.f32 %v1326_v21, %v147_v27  ;;  %1502 = vmatpush3.msra.mxu1 %v1750_v26  ;;  %1524 = vmatpush3.msra.mxu0 %v1750_v26 }
  0xda   :  { %v1457_v30 = vpop.f32.mrf.mxu0  ;;  %1503 = vmatprep.subr.mxu1 %v1670_v18  ;;  %1525 = vmatprep.subr.mxu0 %v1670_v18 }
  0xdb   :  { %1472 = vmatprep.mubr.msk.f32.mxu1 %vm196_vm1, %v148_v28  ;;  %1492 = vmatprep.mubr.msk.f32.mxu0 %vm196_vm1, %v148_v28  ;;  %v163_v34 = vadd.f32 %v1457_v30, %v1326_v21 }
  0xdc   :  { %v157_v32 = vpop.f32.mrf.mxu0  ;;  %1473 = vmatmul.mubr.msk.f32.gmra.mxu1 %vm196_vm1, %v153_v29  ;;  %1493 = vmatmul.mubr.msk.f32.gmra.mxu0 %vm196_vm1, %v153_v29 }
  0xdd   :  { %v158_v33 = vadd.f32 %v1326_v21, %v157_v32  ;;  %1504 = vmatpush3.msra.mxu1 %v1759_v31  ;;  %1526 = vmatpush3.msra.mxu0 %v1759_v31 }
  0xde   :  { %v1460_v35 = vpop.f32.mrf.mxu0  ;;  %1505 = vmatprep.subr.mxu1 %v1670_v18  ;;  %1527 = vmatprep.subr.mxu0 %v1670_v18 }
  0xdf   :  { %1475 = vmatprep.mubr.msk.f32.mxu1 %vm196_vm1, %v158_v33  ;;  %1495 = vmatprep.mubr.msk.f32.mxu0 %vm196_vm1, %v158_v33  ;;  %v173_v39 = vadd.f32 %v1460_v35, %v1326_v21 }
  0xe0   :  { %v167_v37 = vpop.f32.mrf.mxu0  ;;  %1476 = vmatmul.mubr.msk.f32.gmra.mxu1 %vm196_vm1, %v163_v34  ;;  %1496 = vmatmul.mubr.msk.f32.gmra.mxu0 %vm196_vm1, %v163_v34 }
  0xe1   :  { %v168_v38 = vadd.f32 %v1326_v21, %v167_v37  ;;  %1506 = vmatpush3.msra.mxu1 %v1769_v36  ;;  %1528 = vmatpush3.msra.mxu0 %v1769_v36 }
  0xe2   :  { %1507 = vmatprep.subr.mxu1 %v1670_v18  ;;  %1529 = vmatprep.subr.mxu0 %v1670_v18 }
  0xe3   :  { %1478 = vmatprep.mubr.msk.f32.mxu1 %vm196_vm1, %v168_v38  ;;  %1498 = vmatprep.mubr.msk.f32.mxu0 %vm196_vm1, %v168_v38 }
  0xe4   :  { %1479 = vmatmul.mubr.msk.f32.gmra.mxu1 %vm196_vm1, %v173_v39  ;;  %1499 = vmatmul.mubr.msk.f32.gmra.mxu0 %vm196_vm1, %v173_v39 }
  0xe5   :  { %1508 = vmatpush3.msra.mxu1 %v1779_v40  ;;  %1509 = vmatprep.mubr.msk.f32.mxu1 %vm1672_vm2, %v1670_v18 }
  0xe6   :  { %1512 = vmatprep.subr.mxu1 %v1670_v18  ;;  %1530 = vmatpush3.msra.mxu0 %v1779_v40 }
  0xe7   :  { %1531 = vmatprep.mubr.msk.f32.mxu0 %vm1672_vm2, %v1670_v18  ;;  %1545 = vmatprep.subr.mxu0 %v1670_v18 }
  0xe8   :  { %1510 = vmatmul.mubr.f32.vlgmr.msra.gmra.mxu1 %v1670_v18 }
  0xe9   :  { %1513 = vmatpush3.msra.mxu1 %v1750_v26  ;;  %1520 = vmatprep.mubr.msk.f32.mxu1 %vm1672_vm2, %v1670_v18 }
  0xea   :  { %1514 = vmatprep.subr.mxu1 %v1670_v18 }
  0xeb   :  { %1515 = vmatpush3.msra.mxu1 %v1759_v31 }
  0xec   :  { %1516 = vmatprep.subr.mxu1 %v1670_v18 }
  0xed   :  { %1517 = vmatpush3.msra.mxu1 %v1769_v36 }
  0xee   :  { %1518 = vmatprep.subr.mxu1 %v1670_v18 }
  0xef   :  { %1519 = vmatpush3.msra.mxu1 %v1779_v40 }
  0xf0   :  { %1534 = vmatprep.subr.mxu1 %v1670_v18 }
 0x198   :  { %v1471_v42 = vpop.f32.mrf.mxu1  ;;  %v1491_v43 = vpop.f32.mrf.mxu0 }
 0x199   :  { %v1808_v44 = vadd.f32 %v1471_v42, %v1335_v41 }
 0x19a   :  { %v287_v45 = vpop.f32.mrf.mxu1  ;;  %v392_v46 = vpop.f32.mrf.mxu0 }
 0x19b   :  { %v288_v10 = vadd.f32 %v1335_v41, %v287_v45 }
 0x19c   :  { %v1474_v47 = vpop.f32.mrf.mxu1  ;;  %v1494_v48 = vpop.f32.mrf.mxu0 }
 0x19d   :  { %v303_v49 = vadd.f32 %v1474_v47, %v1335_v41 }
 0x19e   :  { %v297_v50 = vpop.f32.mrf.mxu1  ;;  %v402_v51 = vpop.f32.mrf.mxu0 }
 0x19f   :  { %v298_v52 = vadd.f32 %v1335_v41, %v297_v50 }
 0x1a0   :  { %v1477_v53 = vpop.f32.mrf.mxu1  ;;  %v1497_v54 = vpop.f32.mrf.mxu0 }
 0x1a1   :  { %v313_v55 = vadd.f32 %v1477_v53, %v1335_v41  ;;  %v1810_v56 = vadd.f32 %v1497_v54, %v298_v52 }
 0x1a2   :  { %v307_v57 = vpop.f32.mrf.mxu1  ;;  %v412_v58 = vpop.f32.mrf.mxu0 }
 0x1a3   :  { %v1812_v59 = vadd.f32 %v402_v51, %v313_v55  ;;  %v308_v60 = vadd.f32 %v1335_v41, %v307_v57  ;;  %v1814_v61 = vadd.f32 %v412_v58, %v303_v49 }
 0x1a4   :  { %v1480_v62 = vpop.f32.mrf.mxu1  ;;  %v1500_v9 = vpop.f32.mrf.mxu0 }
 0x1a5   :  { %v1816_v63 = vadd.f32 %v1494_v48, %v308_v60  ;;  %v323_v0 = vadd.f32 %v1480_v62, %v1335_v41  ;;  %v431_v11 = vadd.f32 %v1500_v9, %v288_v10 }
 0x1a6   :  { %v317_v1 = vpop.f32.mrf.mxu1  ;;  %v422_v34 = vpop.f32.mrf.mxu0 }
 0x1a7   :  { %v1820_v3 = vadd.f32 %v392_v46, %v323_v0  ;;  %v318_v4 = vadd.f32 %v1335_v41, %v317_v1  ;;  %v543_v35 = vadd.f32 %v422_v34, %v1808_v44 }
 0x1a8   :  { %v501_v5 = vpop.f32.mrf.mxu1 }
 0x1a9   :  { %v1822_v6 = vadd.f32 %v1491_v43, %v318_v4  ;;  %v520_v7 = vadd.f32 %v1818_v2, %v501_v5  ;;  %v505_v12 = vadd.f32 %v501_v5, %v431_v11 }
 0x1aa   :  { %v1511_v8 = vpop.f32.mrf.mxu1 }
 0x1ab   :  { %522 = vrot.lane.b32.xlu0 %v520_v7, %s1671_s16  ;;  %v1352_v13 = vmul.f32 -1.442695, %v505_v12 }
 0x1ad   :  { %1597 = vpow2.f32 %v1352_v13 }
 0x1ba   :  { %v1598_v14 = vpop.eup %1597 }
 0x1bb   :  { %v509_v15 = vadd.f32 1.0, %v1598_v14 }
 0x1bd   :  { %1599 = vrcp.f32 %v509_v15 }
 0x1ca   :  { %v1600_v16 = vpop.eup %1599 }
 0x21d   :  { %v523_v17 = vpop.permute.xlu0 %522 }
 0x21e   :  { %v525_v19 = vmul.f32 %v1600_v16, %v523_v17 }
 0x220   :  { %527 = vrot.lane.b32.xlu1 %v525_v19, %s1671_s16 }
 0x292   :  { %v528_v20 = vpop.permute.xlu1 %527 }
 0x293   :  { %v530_v21 = vadd.f32 %v528_v20, %v431_v11 }
 0x295   :  { %1601 = vtanh.f32 %v530_v21 }
 0x2a2   :  { %v1602_v22 = vpop.eup %1601 }
 0x2a3   :  { %v532_v23 = vsub.f32 0.0, %v1602_v22 }
 0x2a5   :  { %534 = vrot.lane.b32.xlu1 %v532_v23, %s1673_s2 }
 0x317   :  { %v535_v24 = vpop.permute.xlu1 %534 }
 0x318   :  { %v537_v25 = vmul.f32 %v1600_v16, %v535_v24 }
 0x31a   :  { %539 = vrot.lane.b32.xlu0 %v537_v25, %s1674_s21 }
 0x38c   :  { %v540_v27 = vpop.permute.xlu0 %539 }
 0x38d   :  { %v1829_v28 = vadd.f32 %v1602_v22, %v540_v27 }
 0x38f   :  { %545 = vrot.lane.b32.xlu1 %v1829_v28, %s1671_s16 }
 0x401   :  { %v546_v29 = vpop.permute.xlu1 %545 }
 0x402   :  { %1521 = vmatmul.mubr.msk.f32.vlgmr.msra.gmra.mxu1 %vm196_vm1, %v546_v29 }
 0x403   :  { %1535 = vmatpush3.msra.mxu1 %v1750_v26  ;;  %1542 = vmatprep.mubr.msk.f32.mxu1 %vm1672_vm2, %v1670_v18 }
 0x404   :  { %1536 = vmatprep.subr.mxu1 %v1670_v18 }
 0x405   :  { %1537 = vmatpush3.msra.mxu1 %v1759_v31 }
 0x406   :  { %1538 = vmatprep.subr.mxu1 %v1670_v18 }
 0x407   :  { %1539 = vmatpush3.msra.mxu1 %v1769_v36 }
 0x408   :  { %1540 = vmatprep.subr.mxu1 %v1670_v18 }
 0x409   :  { %1541 = vmatpush3.msra.mxu1 %v1779_v40 }
 0x40a   :  { %1556 = vmatprep.subr.mxu1 %v1670_v18 }
 0x4c2   :  { %v615_v30 = vpop.f32.mrf.mxu1 }
 0x4c3   :  { %v626_v32 = vadd.f32 %v615_v30, %v1818_v2  ;;  %v619_v37 = vadd.f32 %v615_v30, %v543_v35 }
 0x4c4   :  { %v1522_v33 = vpop.f32.mrf.mxu1 }
 0x4c5   :  { %628 = vrot.lane.b32.xlu0 %v626_v32, %s1671_s16  ;;  %v1355_v38 = vmul.f32 -1.442695, %v619_v37 }
 0x4c7   :  { %1603 = vpow2.f32 %v1355_v38 }
 0x4d4   :  { %v1604_v39 = vpop.eup %1603 }
 0x4d5   :  { %v623_v41 = vadd.f32 1.0, %v1604_v39 }
 0x4d7   :  { %1605 = vrcp.f32 %v623_v41 }
 0x4e4   :  { %v1606_v42 = vpop.eup %1605 }
 0x537   :  { %v629_v43 = vpop.permute.xlu0 %628 }
 0x538   :  { %v631_v45 = vmul.f32 %v1606_v42, %v629_v43 }
 0x53a   :  { %633 = vrot.lane.b32.xlu1 %v631_v45, %s1671_s16 }
 0x5ac   :  { %v634_v46 = vpop.permute.xlu1 %633 }
 0x5ad   :  { %v636_v47 = vadd.f32 %v634_v46, %v543_v35 }
 0x5af   :  { %1607 = vtanh.f32 %v636_v47 }
 0x5bc   :  { %v1608_v48 = vpop.eup %1607 }
 0x5bd   :  { %v638_v49 = vsub.f32 %v1829_v28, %v1608_v48 }
 0x5bf   :  { %640 = vrot.lane.b32.xlu0 %v638_v49, %s1673_s2 }
 0x631   :  { %v641_v44 = vpop.permute.xlu0 %640 }
 0x632   :  { %v643_v50 = vmul.f32 %v1606_v42, %v641_v44 }
 0x634   :  { %645 = vrot.lane.b32.xlu1 %v643_v50, %s1674_s21 }
 0x6a6   :  { %v646_v51 = vpop.permute.xlu1 %645 }
 0x6a7   :  { %v648_v52 = vadd.f32 %v1608_v48, %v646_v51 }
 0x6a9   :  { %651 = vrot.lane.b32.xlu0 %v648_v52, %s1671_s16 }
 0x71b   :  { %v652_v53 = vpop.permute.xlu0 %651 }
 0x71c   :  { %1532 = vmatmul.mubr.msk.f32.vlgmr.msra.gmra.mxu0 %vm196_vm1, %v652_v53 }
 0x71d   :  { %1546 = vmatpush3.msra.mxu0 %v1750_v26  ;;  %1553 = vmatprep.mubr.msk.f32.mxu0 %vm1672_vm2, %v1670_v18 }
 0x71e   :  { %1547 = vmatprep.subr.mxu0 %v1670_v18 }
 0x71f   :  { %1548 = vmatpush3.msra.mxu0 %v1759_v31 }
 0x720   :  { %1549 = vmatprep.subr.mxu0 %v1670_v18 }
 0x721   :  { %1550 = vmatpush3.msra.mxu0 %v1769_v36 }
 0x722   :  { %1551 = vmatprep.subr.mxu0 %v1670_v18 }
 0x723   :  { %1552 = vmatpush3.msra.mxu0 %v1779_v40 }
 0x724   :  { %1567 = vmatprep.subr.mxu0 %v1670_v18 }
 0x7dc   :  { %v721_v54 = vpop.f32.mrf.mxu0 }
 0x7dd   :  { %v732_v55 = vadd.f32 %v721_v54, %v1818_v2  ;;  %v725_v58 = vadd.f32 %v721_v54, %v1810_v56 }
 0x7de   :  { %v1533_v57 = vpop.f32.mrf.mxu0 }
 0x7df   :  { %734 = vrot.lane.b32.xlu1 %v732_v55, %s1671_s16  ;;  %v1357_v60 = vmul.f32 -1.442695, %v725_v58 }
 0x7e1   :  { %1609 = vpow2.f32 %v1357_v60 }
 0x7ee   :  { %v1610_v62 = vpop.eup %1609 }
 0x7ef   :  { %v729_v0 = vadd.f32 1.0, %v1610_v62 }
 0x7f1   :  { %1611 = vrcp.f32 %v729_v0 }
 0x7fe   :  { %v1612_v1 = vpop.eup %1611 }
 0x851   :  { %v735_v4 = vpop.permute.xlu1 %734 }
 0x852   :  { %v737_v5 = vmul.f32 %v1612_v1, %v735_v4 }
 0x854   :  { %739 = vrot.lane.b32.xlu0 %v737_v5, %s1671_s16 }
 0x8c6   :  { %v740_v7 = vpop.permute.xlu0 %739 }
 0x8c7   :  { %v742_v8 = vadd.f32 %v740_v7, %v1810_v56 }
 0x8c9   :  { %1613 = vtanh.f32 %v742_v8 }
 0x8d6   :  { %v1614_v9 = vpop.eup %1613 }
 0x8d7   :  { %v744_v10 = vsub.f32 %v648_v52, %v1614_v9 }
 0x8d9   :  { %746 = vrot.lane.b32.xlu1 %v744_v10, %s1673_s2 }
 0x94b   :  { %v747_v11 = vpop.permute.xlu1 %746 }
 0x94c   :  { %v749_v12 = vmul.f32 %v1612_v1, %v747_v11 }
 0x94e   :  { %751 = vrot.lane.b32.xlu0 %v749_v12, %s1674_s21 }
 0x9c0   :  { %v752_v13 = vpop.permute.xlu0 %751 }
 0x9c1   :  { %v754_v14 = vadd.f32 %v1614_v9, %v752_v13 }
 0x9c3   :  { %757 = vrot.lane.b32.xlu1 %v754_v14, %s1671_s16 }
 0xa35   :  { %v758_v15 = vpop.permute.xlu1 %757 }
 0xa36   :  { %1543 = vmatmul.mubr.msk.f32.vlgmr.msra.gmra.mxu1 %vm196_vm1, %v758_v15 }
 0xa37   :  { %1557 = vmatpush3.msra.mxu1 %v1750_v26  ;;  %1564 = vmatprep.mubr.msk.f32.mxu1 %vm1672_vm2, %v1670_v18 }
 0xa38   :  { %1558 = vmatprep.subr.mxu1 %v1670_v18 }
 0xa39   :  { %1559 = vmatpush3.msra.mxu1 %v1759_v31 }
 0xa3a   :  { %1560 = vmatprep.subr.mxu1 %v1670_v18 }
 0xa3b   :  { %1561 = vmatpush3.msra.mxu1 %v1769_v36 }
 0xa3c   :  { %1562 = vmatprep.subr.mxu1 %v1670_v18 }
 0xa3d   :  { %1563 = vmatpush3.msra.mxu1 %v1779_v40 }
 0xa3e   :  { %1578 = vmatprep.subr.mxu1 %v1670_v18 }
 0xaf6   :  { %v827_v56 = vpop.f32.mrf.mxu1 }
 0xaf7   :  { %v838_v16 = vadd.f32 %v827_v56, %v1818_v2  ;;  %v831_v19 = vadd.f32 %v827_v56, %v1814_v61 }
 0xaf8   :  { %v1544_v17 = vpop.f32.mrf.mxu1 }
 0xaf9   :  { %840 = vrot.lane.b32.xlu0 %v838_v16, %s1671_s16  ;;  %v1359_v20 = vmul.f32 -1.442695, %v831_v19 }
 0xafb   :  { %1615 = vpow2.f32 %v1359_v20 }
 0xb08   :  { %v1616_v21 = vpop.eup %1615 }
 0xb09   :  { %v835_v22 = vadd.f32 1.0, %v1616_v21 }
 0xb0b   :  { %1617 = vrcp.f32 %v835_v22 }
 0xb18   :  { %v1618_v23 = vpop.eup %1617 }
 0xb6b   :  { %v841_v24 = vpop.permute.xlu0 %840 }
 0xb6c   :  { %v843_v25 = vmul.f32 %v1618_v23, %v841_v24 }
 0xb6e   :  { %845 = vrot.lane.b32.xlu1 %v843_v25, %s1671_s16 }
 0xbe0   :  { %v846_v27 = vpop.permute.xlu1 %845 }
 0xbe1   :  { %v848_v29 = vadd.f32 %v846_v27, %v1814_v61 }
 0xbe3   :  { %1619 = vtanh.f32 %v848_v29 }
 0xbf0   :  { %v1620_v30 = vpop.eup %1619 }
 0xbf1   :  { %v850_v32 = vsub.f32 %v754_v14, %v1620_v30 }
 0xbf3   :  { %852 = vrot.lane.b32.xlu0 %v850_v32, %s1673_s2 }
 0xc65   :  { %v853_v33 = vpop.permute.xlu0 %852 }
 0xc66   :  { %v855_v34 = vmul.f32 %v1618_v23, %v853_v33 }
 0xc68   :  { %857 = vrot.lane.b32.xlu1 %v855_v34, %s1674_s21 }
 0xcda   :  { %v858_v35 = vpop.permute.xlu1 %857 }
 0xcdb   :  { %v860_v37 = vadd.f32 %v1620_v30, %v858_v35 }
 0xcdd   :  { %863 = vrot.lane.b32.xlu0 %v860_v37, %s1671_s16 }
 0xd4f   :  { %v864_v38 = vpop.permute.xlu0 %863 }
 0xd50   :  { %1554 = vmatmul.mubr.msk.f32.vlgmr.msra.gmra.mxu0 %vm196_vm1, %v864_v38 }
 0xd51   :  { %1568 = vmatpush3.msra.mxu0 %v1750_v26  ;;  %1575 = vmatprep.mubr.msk.f32.mxu0 %vm1672_vm2, %v1670_v18 }
 0xd52   :  { %1569 = vmatprep.subr.mxu0 %v1670_v18 }
 0xd53   :  { %1570 = vmatpush3.msra.mxu0 %v1759_v31 }
 0xd54   :  { %1571 = vmatprep.subr.mxu0 %v1670_v18 }
 0xd55   :  { %1572 = vmatpush3.msra.mxu0 %v1769_v36 }
 0xd56   :  { %1573 = vmatprep.subr.mxu0 %v1670_v18 }
 0xd57   :  { %1574 = vmatpush3.msra.mxu0 %v1779_v40 }
 0xe10   :  { %v933_v61 = vpop.f32.mrf.mxu0 }
 0xe11   :  { %v944_v39 = vadd.f32 %v933_v61, %v1818_v2  ;;  %v937_v42 = vadd.f32 %v933_v61, %v1816_v63 }
 0xe12   :  { %v1555_v41 = vpop.f32.mrf.mxu0 }
 0xe13   :  { %946 = vrot.lane.b32.xlu1 %v944_v39, %s1671_s16  ;;  %v1361_v43 = vmul.f32 -1.442695, %v937_v42 }
 0xe15   :  { %1621 = vpow2.f32 %v1361_v43 }
 0xe22   :  { %v1622_v45 = vpop.eup %1621 }
 0xe23   :  { %v941_v46 = vadd.f32 1.0, %v1622_v45 }
 0xe25   :  { %1623 = vrcp.f32 %v941_v46 }
 0xe32   :  { %v1624_v47 = vpop.eup %1623 }
 0xe85   :  { %v947_v48 = vpop.permute.xlu1 %946 }
 0xe86   :  { %v949_v49 = vmul.f32 %v1624_v47, %v947_v48 }
 0xe88   :  { %951 = vrot.lane.b32.xlu0 %v949_v49, %s1671_s16  ;;  %v1368_v49 = vld [vmem:[%s1963_s3 + $0x11] ss:$0 sm:$0xff] }
 0xefa   :  { %v952_v44 = vpop.permute.xlu0 %951 }
 0xefb   :  { %v954_v50 = vadd.f32 %v952_v44, %v1816_v63 }
 0xefd   :  { %1625 = vtanh.f32 %v954_v50 }
 0xf0a   :  { %v1626_v51 = vpop.eup %1625 }
 0xf0b   :  { %v956_v52 = vsub.f32 %v860_v37, %v1626_v51 }
 0xf0d   :  { %958 = vrot.lane.b32.xlu1 %v956_v52, %s1673_s2 }
 0xf7f   :  { %v959_v53 = vpop.permute.xlu1 %958 }
 0xf80   :  { %v961_v54 = vmul.f32 %v1624_v47, %v959_v53 }
 0xf82   :  { %963 = vrot.lane.b32.xlu0 %v961_v54, %s1674_s21 }
 0xff4   :  { %v964_v55 = vpop.permute.xlu0 %963 }
 0xff5   :  { %v966_v57 = vadd.f32 %v1626_v51, %v964_v55  ;;  %v1369_v51 = vld [vmem:[%s1963_s3 + $0x12] ss:$0 sm:$0xff] }
 0xff7   :  { %969 = vrot.lane.b32.xlu1 %v966_v57, %s1671_s16 }
0x1069   :  { %v970_v58 = vpop.permute.xlu1 %969 }
0x106a   :  { %1565 = vmatmul.mubr.msk.f32.vlgmr.msra.gmra.mxu1 %vm196_vm1, %v970_v58 }
0x106b   :  { %1579 = vmatpush3.msra.mxu1 %v1750_v26  ;;  %1586 = vmatprep.mubr.msk.f32.mxu1 %vm1672_vm2, %v1670_v18 }
0x106c   :  { %1580 = vmatprep.subr.mxu1 %v1670_v18 }
0x106d   :  { %1581 = vmatpush3.msra.mxu1 %v1759_v31 }
0x106e   :  { %1582 = vmatprep.subr.mxu1 %v1670_v18 }
0x106f   :  { %1583 = vmatpush3.msra.mxu1 %v1769_v36 }
0x1070   :  { %1584 = vmatprep.subr.mxu1 %v1670_v18 }
0x1071   :  { %1585 = vmatpush3.msra.mxu1 %v1779_v40 }
0x112a   :  { %v1039_v63 = vpop.f32.mrf.mxu1 }
0x112b   :  { %v1050_v60 = vadd.f32 %v1039_v63, %v1818_v2  ;;  %v1043_v26 = vadd.f32 %v1039_v63, %v1812_v59 }
0x112c   :  { %v1566_v62 = vpop.f32.mrf.mxu1 }
0x112d   :  { %1052 = vrot.lane.b32.xlu0 %v1050_v60, %s1671_s16  ;;  %v1363_v0 = vmul.f32 -1.442695, %v1043_v26  ;;  %v1370_v62 = vld [vmem:[%s1963_s3 + $0x13] ss:$0 sm:$0xff] }
0x112f   :  { %1627 = vpow2.f32 %v1363_v0 }
0x113c   :  { %v1628_v1 = vpop.eup %1627 }
0x113d   :  { %v1047_v31 = vadd.f32 1.0, %v1628_v1 }
0x113f   :  { %1629 = vrcp.f32 %v1047_v31 }
0x114c   :  { %v1630_v4 = vpop.eup %1629 }
0x119f   :  { %v1053_v5 = vpop.permute.xlu0 %1052 }
0x11a0   :  { %v1055_v36 = vmul.f32 %v1630_v4, %v1053_v5 }
0x11a2   :  { %1057 = vrot.lane.b32.xlu1 %v1055_v36, %s1671_s16 }
0x1214   :  { %v1058_v18 = vpop.permute.xlu1 %1057 }
0x1215   :  { %v1060_v40 = vadd.f32 %v1058_v18, %v1812_v59 }
0x1217   :  { %1631 = vtanh.f32 %v1060_v40 }
0x1224   :  { %v1632_v7 = vpop.eup %1631 }
0x1225   :  { %v1062_v8 = vsub.f32 %v966_v57, %v1632_v7 }
0x1227   :  { %1064 = vrot.lane.b32.xlu0 %v1062_v8, %s1673_s2 }
0x1299   :  { %v1065_v9 = vpop.permute.xlu0 %1064 }
0x129a   :  { %v1067_v10 = vmul.f32 %v1630_v4, %v1065_v9 }
0x129c   :  { %1069 = vrot.lane.b32.xlu1 %v1067_v10, %s1674_s21 }
0x130e   :  { %v1070_v11 = vpop.permute.xlu1 %1069 }
0x130f   :  { %v1072_v12 = vadd.f32 %v1632_v7, %v1070_v11 }
0x1311   :  { %1075 = vrot.lane.b32.xlu0 %v1072_v12, %s1671_s16 }
0x1383   :  { %v1076_v13 = vpop.permute.xlu0 %1075 }
0x1384   :  { %1576 = vmatmul.mubr.msk.f32.vlgmr.msra.gmra.mxu0 %vm196_vm1, %v1076_v13 }
0x1444   :  { %v1145_v14 = vpop.f32.mrf.mxu0 }
0x1445   :  { %v1156_v15 = vadd.f32 %v1145_v14, %v1818_v2  ;;  %v1149_v56 = vadd.f32 %v1145_v14, %v1822_v6 }
0x1446   :  { %v1577_v59 = vpop.f32.mrf.mxu0 }
0x1447   :  { %1158 = vrot.lane.b32.xlu1 %v1156_v15, %s1671_s16  ;;  %v1365_v16 = vmul.f32 -1.442695, %v1149_v56 }
0x1449   :  { %1633 = vpow2.f32 %v1365_v16 }
0x1456   :  { %v1634_v17 = vpop.eup %1633 }
0x1457   :  { %v1153_v19 = vadd.f32 1.0, %v1634_v17 }
0x1459   :  { %1635 = vrcp.f32 %v1153_v19 }
0x1466   :  { %v1636_v20 = vpop.eup %1635 }
0x14b9   :  { %v1159_v21 = vpop.permute.xlu1 %1158 }
0x14ba   :  { %v1161_v22 = vmul.f32 %v1636_v20, %v1159_v21 }
0x14bc   :  { %1163 = vrot.lane.b32.xlu0 %v1161_v22, %s1671_s16 }
0x152e   :  { %v1164_v23 = vpop.permute.xlu0 %1163 }
0x152f   :  { %v1166_v24 = vadd.f32 %v1164_v23, %v1822_v6 }
0x1531   :  { %1637 = vtanh.f32 %v1166_v24 }
0x153e   :  { %v1638_v25 = vpop.eup %1637 }
0x153f   :  { %v1168_v27 = vsub.f32 %v1072_v12, %v1638_v25 }
0x1541   :  { %1170 = vrot.lane.b32.xlu1 %v1168_v27, %s1673_s2 }
0x15b3   :  { %v1171_v29 = vpop.permute.xlu1 %1170 }
0x15b4   :  { %v1173_v30 = vmul.f32 %v1636_v20, %v1171_v29 }
0x15b6   :  { %1175 = vrot.lane.b32.xlu0 %v1173_v30, %s1674_s21 }
0x1628   :  { %v1176_v32 = vpop.permute.xlu0 %1175 }
0x1629   :  { %v1178_v33 = vadd.f32 %v1638_v25, %v1176_v32 }
0x162b   :  { %1181 = vrot.lane.b32.xlu1 %v1178_v33, %s1671_s16 }
0x169d   :  { %v1182_v34 = vpop.permute.xlu1 %1181 }
0x169e   :  { %1587 = vmatmul.mubr.msk.f32.vlgmr.msra.gmra.mxu1 %vm196_vm1, %v1182_v34 }
0x175e   :  { %v1251_v35 = vpop.f32.mrf.mxu1 }
0x175f   :  { %v1262_v37 = vadd.f32 %v1251_v35, %v1818_v2  ;;  %v1255_v38 = vadd.f32 %v1251_v35, %v1820_v3 }
0x1760   :  { %v1588_v6 = vpop.f32.mrf.mxu1 }
0x1761   :  { %1264 = vrot.lane.b32.xlu0 %v1262_v37, %s1671_s16  ;;  %v1367_v61 = vmul.f32 -1.442695, %v1255_v38 }
0x1763   :  { %1639 = vpow2.f32 %v1367_v61 }
0x1770   :  { %v1640_v39 = vpop.eup %1639 }
0x1771   :  { %v1259_v41 = vadd.f32 1.0, %v1640_v39 }
0x1773   :  { %1641 = vrcp.f32 %v1259_v41 }
0x1780   :  { %v1642_v42 = vpop.eup %1641 }
0x17d3   :  { %v1265_v43 = vpop.permute.xlu0 %1264 }
0x17d4   :  { %v1267_v45 = vmul.f32 %v1642_v42, %v1265_v43 }
0x17d6   :  { %1269 = vrot.lane.b32.xlu1 %v1267_v45, %s1671_s16 }
0x1848   :  { %v1270_v46 = vpop.permute.xlu1 %1269 }
0x1849   :  { %v1272_v47 = vadd.f32 %v1270_v46, %v1820_v3 }
0x184b   :  { %1643 = vtanh.f32 %v1272_v47 }
0x1858   :  { %v1644_v2 = vpop.eup %1643 }
0x1859   :  { %v1274_v48 = vsub.f32 %v1178_v33, %v1644_v2 }
0x185b   :  { %1276 = vrot.lane.b32.xlu0 %v1274_v48, %s1673_s2 }
0x185f   :  { %1293 = vrot.lane.b32.xlu0 %v1368_v49, %s1671_s16 }
0x18cd   :  { %v1277_v44 = vpop.permute.xlu0 %1276 }
0x18ce   :  { %v1279_v50 = vmul.f32 %v1642_v42, %v1277_v44 }
0x18d0   :  { %1281 = vrot.lane.b32.xlu1 %v1279_v50, %s1674_s21 }
0x18d1   :  { %v1294_v53 = vpop.permute.xlu0 %1293 }
0x18d4   :  { %1302 = vrot.lane.b32.xlu1 %v1369_v51, %s1671_s16 }
0x1942   :  { %v1282_v3 = vpop.permute.xlu1 %1281 }
0x1943   :  { %v1284_v52 = vadd.f32 %v1644_v2, %v1282_v3 }
0x1945   :  { %v1296_v55 = vmul.f32 %v1294_v53, %v1284_v52 }
0x1946   :  { %v1303_v54 = vpop.permute.xlu1 %1302 }
0x1947   :  { %v1305_v57 = vmul.f32 %v1303_v54, %v1829_v28 }
0x1949   :  { %v1306_v58 = vadd.f32 %v1305_v57, %v1296_v55 }
0x194b   :  { %1308 = vrot.lane.b32.xlu0 %v1306_v58, %s1671_s16 }
0x19bd   :  { %v1309_v63 = vpop.permute.xlu0 %1308 }
0x19be   :  { %v1311_v60 = vsel %vm196_vm1, %v1309_v63, 0.0 }
0x19bf   :  { %1312 = vadd.xlane.f32.xlu1 %v1311_v60 }
0x1a48   :  { %v1313_v26 = vpop.xlane.xlu1 %1312 }
0x1a49   :  { %v1318_v0 = vadd.f32 %v1370_v62, %v1313_v26 }
0x1a4b   :  { %1320 = vst.msk [vmem:[%s1964_s4] sm:$0xff] %vm1319_vm3, %v1318_v0 }
0x1a4c   :  { %1325 = vsyncpa [#allocation3], 1 }

</bundles_post_ra>
